<compile_context>
chip_gen: v6e
topology: v6e:2x2x1
jax: 0.10.0
libtpu: 0.0.40
codegen_flags: <defaults>
</compile_context>

<pallas_src>
import jax
import jax.numpy as jnp
from jax.experimental import pallas as pl
from jax.experimental.pallas import tpu as pltpu

_NEG_BIG = -1e30  # bias for padded vocab columns: never wins the max, exp underflows to 0.


def _round_up(x, m):
    return ((x + m - 1) // m) * m


def _vocab_tiling(V, tv):
    """Lane-aligned vocab tile that divides round_up(V, 128): V_pad is tv-independent and the
    host-side trim is limited to the minimal 128-padding."""
    tv = max(128, _round_up(tv, 128))
    V128 = _round_up(V, 128)
    tv_eff = 128
    for cand in range(min(tv, V128), 127, -128):
        if V128 % cand == 0:
            tv_eff = cand
            break
    return tv_eff, V128


def _row_tiling(M, tm):
    tm = max(8, _round_up(tm, 8))
    tm_eff = min(tm, _round_up(M, 8))
    # Prefer >= 2 row tiles so the "parallel" row axis can shard across TensorCores (v7x).
    if M > 8 and _round_up(M, tm_eff) // tm_eff < 2:
        tm_eff = _round_up(-(-M // 2), 8)
    M_pad = _round_up(M, tm_eff)
    return tm_eff, M_pad


def _vmem_limit_bytes():
    # Per-generation VMEM budget: ~85% of physical (headroom for compiler scratch, semaphores,
    # double buffers), capped at ~110 MiB on the 128-MiB parts (v5e / v6e).
    cap = 128 * 1024 * 1024
    try:
        cap = int(pltpu.get_tpu_info().vmem_capacity_bytes)
    except Exception:
        pass
    return min(int(cap * 0.85), 110 * 1024 * 1024)


def _lse_kernel(x_ref, w_ref, b_ref, lse_ref, m_sc, l_sc):
    # x_ref: (tm, H) bf16   -- token tile, constant across the vocab axis
    # w_ref: (H, tv) bf16   -- streamed vocab tile of the weight
    # b_ref: (1, tv) f32    -- streamed vocab tile of the bias (padded cols = -1e30)
    # lse_ref: (tm, 1) f32  -- per-row logsumexp, written on the last vocab step
    j = pl.program_id(1)
    nj = pl.num_programs(1)

    @pl.when(j == 0)
    def _init():
        m_sc[...] = jnp.full_like(m_sc, -jnp.inf)
        l_sc[...] = jnp.zeros_like(l_sc)

    logits = jnp.dot(x_ref[...], w_ref[...], preferred_element_type=jnp.float32) + b_ref[...]

    m_prev = m_sc[...]
    m_new = jnp.maximum(m_prev, jnp.max(logits, axis=-1, keepdims=True))
    l_sc[...] = (l_sc[...] * jnp.exp(m_prev - m_new)
                 + jnp.sum(jnp.exp(logits - m_new), axis=-1, keepdims=True))
    m_sc[...] = m_new

    @pl.when(j == nj - 1)
    def _finish():
        lse_ref[...] = m_sc[...] + jnp.log(l_sc[...])


def _logprob_kernel(x_ref, w_ref, b_ref, lse_ref, o_ref):
    # Recompute the (tm, tv) logits tile, subtract the per-row lse, write once (lane-dense).
    logits = jnp.dot(x_ref[...], w_ref[...], preferred_element_type=jnp.float32) + b_ref[...]
    o_ref[...] = (logits - lse_ref[...]).astype(o_ref.dtype)


def prepare_mlm_params(weight, bias, *, tv=1024):
    """Cast the [H, V] weight to bf16 and pad the vocab axis to a multiple of 128 ONCE.

    Hoist this out of the per-batch call path: re-casting / re-padding on every call costs an
    extra full HBM pass over the largest parameter."""
    H, V = weight.shape
    assert bias.shape == (V,)
    _, V_pad = _vocab_tiling(V, tv)
    w = weight.astype(jnp.bfloat16)
    b = bias.astype(jnp.float32).reshape(1, V)
    if V_pad != V:
        w = jnp.pad(w, ((0, 0), (0, V_pad - V)))                          # zero weight columns
        b = jnp.pad(b, ((0, 0), (0, V_pad - V)), constant_values=_NEG_BIG)  # never win max / lse
    return w, b, V


def masked_language_model_prepared(x, w_pad, b_pad, V, *, tm=512, tv=1024,
                                    out_dtype=jnp.float32):
    """x: [B, S, H]; w_pad: bf16 [H, V_pad]; b_pad: f32 [1, V_pad] -> [B, S, V] log-probs."""
    B, S, H = x.shape
    tv_eff, V_pad = _vocab_tiling(V, tv)
    assert w_pad.shape == (H, V_pad) and b_pad.shape == (1, V_pad)

    M = B * S
    tm_eff, M_pad = _row_tiling(M, tm)

    xr = x.reshape(M, H).astype(jnp.bfloat16)
    if M_pad != M:
        xr = jnp.pad(xr, ((0, M_pad - M), (0, 0)))   # zero rows; trimmed at the end.

    grid = (M_pad // tm_eff, V_pad // tv_eff)
    vmem_limit = _vmem_limit_bytes()

    x_spec = pl.BlockSpec((tm_eff, H), lambda i, j: (i, 0))
    w_spec = pl.BlockSpec((H, tv_eff), lambda i, j: (0, j))
    b_spec = pl.BlockSpec((1, tv_eff), lambda i, j: (0, j))
    lse_spec = pl.BlockSpec((tm_eff, 1), lambda i, j: (i, 0))

    # Pass 1: per-row logsumexp (tiny [M_pad, 1] output; nothing O(tm * V) resident in VMEM).
    lse = pl.pallas_call(
        _lse_kernel,
        out_shape=jax.ShapeDtypeStruct((M_pad, 1), jnp.float32),
        grid_spec=pltpu.PrefetchScalarGridSpec(
            num_scalar_prefetch=0,
            grid=grid,
            in_specs=[x_spec, w_spec, b_spec],
            out_specs=lse_spec,
            scratch_shapes=[pltpu.VMEM((tm_eff, 1), jnp.float32),   # running max
                            pltpu.VMEM((tm_eff, 1), jnp.float32)],  # running sum
        ),
        compiler_params=pltpu.CompilerParams(
            dimension_semantics=("parallel", "arbitrary"),
            vmem_limit_bytes=vmem_limit,
        ),
    )(xr, w_pad, b_pad)

    # Pass 2: normalized log-probs, one lane-dense (tm, tv) store per tile, no epilogue.
    out = pl.pallas_call(
        _logprob_kernel,
        out_shape=jax.ShapeDtypeStruct((M_pad, V_pad), out_dtype),
        grid_spec=pltpu.PrefetchScalarGridSpec(
            num_scalar_prefetch=0,
            grid=grid,
            in_specs=[x_spec, w_spec, b_spec, lse_spec],
            out_specs=pl.BlockSpec((tm_eff, tv_eff), lambda i, j: (i, j)),
        ),
        compiler_params=pltpu.CompilerParams(
            dimension_semantics=("parallel", "parallel"),
            vmem_limit_bytes=vmem_limit,
        ),
    )(xr, w_pad, b_pad, lse)

    # No-op slice when M_pad == M and V is already a multiple of 128.
    out = out[:M, :V]
    return out.reshape(B, S, V)


def masked_language_model(x, weight, bias, *, tm=512, tv=1024, out_dtype=jnp.float32):
    """Convenience wrapper (prepares params each call).  weight: [H, V]; bias: [V]."""
    w_pad, b_pad, V = prepare_mlm_params(weight, bias, tv=tv)
    return masked_language_model_prepared(x, w_pad, b_pad, V, tm=tm, tv=tv, out_dtype=out_dtype)


if __name__ == "__main__":
    # Small deterministic setup: exercises row padding + 2 row tiles (M=18 -> tm=16, M_pad=32
    # so the "parallel" row axis has >=2 steps), and vocab streaming + vocab padding
    # (V=330 -> V_pad=384 = 3 tiles of 128).
    B, S, H, V = 2, 9, 32, 330
    key = jax.random.PRNGKey(0)
    kx, kw, kb = jax.random.split(key, 3)

    x = jax.random.normal(kx, (B, S, H), dtype=jnp.float32)
    # nn.Linear(hidden, vocab): torch weight [V, H], bias [V]; we store W^T = [H, V].
    bound = 1.0 / (H ** 0.5)
    weight = jax.random.uniform(kw, (H, V), minval=-bound, maxval=bound, dtype=jnp.float32)
    bias = jax.random.uniform(kb, (V,), minval=-bound, maxval=bound, dtype=jnp.float32)

    # Prepare (cast + pad) the weights once; reuse across both calls below.
    w_pad, b_pad, V_real = prepare_mlm_params(weight, bias, tv=128)

    out = masked_language_model_prepared(x, w_pad, b_pad, V_real, tm=256, tv=128,
                                         out_dtype=jnp.float32)
    out = jax.block_until_ready(out)

    # Reference mirroring the kernel's bf16 matmul operands / f32 accumulation.
    xb = x.reshape(B * S, H).astype(jnp.bfloat16)
    wb = weight.astype(jnp.bfloat16)
    logits_ref = jnp.dot(xb, wb, preferred_element_type=jnp.float32) + bias
    ref = jax.nn.log_softmax(logits_ref, axis=-1).reshape(B, S, V)

    assert out.shape == (B, S, V)
    assert jnp.allclose(out, ref, atol=2e-3, rtol=2e-3), float(jnp.max(jnp.abs(out - ref)))

    # bf16-output fast path (halves HBM writeback of the largest array); logits / lse stay f32
    # in-kernel, single cast at the final store.
    out_bf16 = masked_language_model_prepared(x, w_pad, b_pad, V_real, tm=256, tv=128,
                                              out_dtype=jnp.bfloat16)
    out_bf16 = jax.block_until_ready(out_bf16)
    assert jnp.allclose(out_bf16.astype(jnp.float32), ref, atol=5e-2, rtol=5e-2)

    # TODO(synk): for MLM training where only masked positions are scored, gather the masked
    # rows before calling the kernel so M shrinks from B*S to the number of masked tokens.
    print("KERNEL_OK")
</pallas_src>

<mosaic_0001>
module attributes {stable_mosaic.version = 11 : i64} {
  func.func @_lse_kernel(%arg0: i32, %arg1: i32, %arg2: memref<16x32xbf16, #tpu.memory_space<vmem>>, %arg3: memref<32x128xbf16, #tpu.memory_space<vmem>>, %arg4: memref<1x128xf32, #tpu.memory_space<vmem>>, %arg5: memref<16x1xf32, #tpu.memory_space<vmem>>, %arg6: memref<16x1xf32, #tpu.memory_space<vmem>>, %arg7: memref<16x1xf32, #tpu.memory_space<vmem>>) attributes {dimension_semantics = [#tpu.dimension_semantics<parallel>, #tpu.dimension_semantics<arbitrary>], iteration_bounds = array<i64: 2, 3>, scalar_prefetch = 0 : i64, scratch_operands = 2 : i64, tpu.core_type = #tpu.core_type<tc>, window_params = [{transform_indices = @transform_0, window_bounds = array<i64: 16, 32>}, {transform_indices = @transform_1, window_bounds = array<i64: 32, 128>}, {transform_indices = @transform_2, window_bounds = array<i64: 1, 128>}, {transform_indices = @transform_3, window_bounds = array<i64: 16, 1>}]} {
    %c0_i32 = arith.constant 0 : i32
    %0 = arith.cmpi eq, %arg1, %c0_i32 : i32
    %1 = arith.extui %0 : i1 to i32
    %c0_i32_0 = arith.constant 0 : i32
    %2 = arith.cmpi ne, %1, %c0_i32_0 : i32
    scf.if %2 {
      %cst_17 = arith.constant 0xFF800000 : f32
      %28 = vector.broadcast %cst_17 : f32 to vector<16x1xf32>
      %c0_18 = arith.constant 0 : index
      %c0_19 = arith.constant 0 : index
      %29 = vector.load %arg6[%c0_18, %c0_19] : memref<16x1xf32, #tpu.memory_space<vmem>>, vector<16x1xf32>
      tpu.vector_store %arg6[%c0_18, %c0_19], %28 {strides = array<i32>} : memref<16x1xf32, #tpu.memory_space<vmem>>, vector<16x1xf32>,
      %cst_20 = arith.constant 0.000000e+00 : f32
      %30 = vector.broadcast %cst_20 : f32 to vector<16x1xf32>
      %c0_21 = arith.constant 0 : index
      %c0_22 = arith.constant 0 : index
      %31 = vector.load %arg7[%c0_21, %c0_22] : memref<16x1xf32, #tpu.memory_space<vmem>>, vector<16x1xf32>
      tpu.vector_store %arg7[%c0_21, %c0_22], %30 {strides = array<i32>} : memref<16x1xf32, #tpu.memory_space<vmem>>, vector<16x1xf32>,
    } else {
    }
    %c0 = arith.constant 0 : index
    %c0_1 = arith.constant 0 : index
    %3 = vector.load %arg2[%c0, %c0_1] : memref<16x32xbf16, #tpu.memory_space<vmem>>, vector<16x32xbf16>
    %c0_2 = arith.constant 0 : index
    %c0_3 = arith.constant 0 : index
    %4 = vector.load %arg3[%c0_2, %c0_3] : memref<32x128xbf16, #tpu.memory_space<vmem>>, vector<32x128xbf16>
    %cst = arith.constant dense<0.000000e+00> : vector<16x128xf32>
    %5 = tpu.matmul %3, %4, %cst {dimension_numbers = #tpu.dot_dimension_numbers<[1], [0], [0], [1], [0, 0, 1, 1], [], []>} : vector<16x32xbf16>, vector<32x128xbf16>, vector<16x128xf32> -> vector<16x128xf32>
    %c0_4 = arith.constant 0 : index
    %c0_5 = arith.constant 0 : index
    %6 = vector.load %arg4[%c0_4, %c0_5] : memref<1x128xf32, #tpu.memory_space<vmem>>, vector<1x128xf32>
    %7 = vector.broadcast %6 : vector<1x128xf32> to vector<16x128xf32>
    %8 = arith.addf %5, %7 : vector<16x128xf32>
    %c0_6 = arith.constant 0 : index
    %c0_7 = arith.constant 0 : index
    %9 = vector.load %arg6[%c0_6, %c0_7] : memref<16x1xf32, #tpu.memory_space<vmem>>, vector<16x1xf32>
    %cst_8 = arith.constant dense<0xFF800000> : vector<16xf32>
    %10 = vector.multi_reduction <maximumf>, %8, %cst_8 [1] : vector<16x128xf32> to vector<16xf32>
    %11 = vector.shape_cast %10 : vector<16xf32> to vector<16x1xf32>
    %12 = arith.maximumf %9, %11 : vector<16x1xf32>
    %c0_9 = arith.constant 0 : index
    %c0_10 = arith.constant 0 : index
    %13 = vector.load %arg7[%c0_9, %c0_10] : memref<16x1xf32, #tpu.memory_space<vmem>>, vector<16x1xf32>
    %14 = arith.subf %9, %12 : vector<16x1xf32>
    %15 = math.exp %14 : vector<16x1xf32>
    %16 = arith.mulf %13, %15 : vector<16x1xf32>
    %17 = vector.broadcast %12 : vector<16x1xf32> to vector<16x128xf32>
    %18 = arith.subf %8, %17 : vector<16x128xf32>
    %19 = math.exp %18 : vector<16x128xf32>
    %cst_11 = arith.constant dense<0.000000e+00> : vector<16xf32>
    %20 = vector.multi_reduction <add>, %19, %cst_11 [1] : vector<16x128xf32> to vector<16xf32>
    %21 = vector.shape_cast %20 : vector<16xf32> to vector<16x1xf32>
    %22 = arith.addf %16, %21 : vector<16x1xf32>
    %c0_12 = arith.constant 0 : index
    %c0_13 = arith.constant 0 : index
    %23 = vector.load %arg7[%c0_12, %c0_13] : memref<16x1xf32, #tpu.memory_space<vmem>>, vector<16x1xf32>
    tpu.vector_store %arg7[%c0_12, %c0_13], %22 {strides = array<i32>} : memref<16x1xf32, #tpu.memory_space<vmem>>, vector<16x1xf32>,
    %c0_14 = arith.constant 0 : index
    %c0_15 = arith.constant 0 : index
    %24 = vector.load %arg6[%c0_14, %c0_15] : memref<16x1xf32, #tpu.memory_space<vmem>>, vector<16x1xf32>
    tpu.vector_store %arg6[%c0_14, %c0_15], %12 {strides = array<i32>} : memref<16x1xf32, #tpu.memory_space<vmem>>, vector<16x1xf32>,
    %c2_i32 = arith.constant 2 : i32
    %25 = arith.cmpi eq, %arg1, %c2_i32 : i32
    %26 = arith.extui %25 : i1 to i32
    %c0_i32_16 = arith.constant 0 : i32
    %27 = arith.cmpi ne, %26, %c0_i32_16 : i32
    scf.if %27 {
      %c0_17 = arith.constant 0 : index
      %c0_18 = arith.constant 0 : index
      %28 = vector.load %arg6[%c0_17, %c0_18] : memref<16x1xf32, #tpu.memory_space<vmem>>, vector<16x1xf32>
      %c0_19 = arith.constant 0 : index
      %c0_20 = arith.constant 0 : index
      %29 = vector.load %arg7[%c0_19, %c0_20] : memref<16x1xf32, #tpu.memory_space<vmem>>, vector<16x1xf32>
      %30 = math.log %29 : vector<16x1xf32>
      %31 = arith.addf %28, %30 : vector<16x1xf32>
      %c0_21 = arith.constant 0 : index
      %c0_22 = arith.constant 0 : index
      %32 = vector.load %arg5[%c0_21, %c0_22] : memref<16x1xf32, #tpu.memory_space<vmem>>, vector<16x1xf32>
      tpu.vector_store %arg5[%c0_21, %c0_22], %31 {strides = array<i32>} : memref<16x1xf32, #tpu.memory_space<vmem>>, vector<16x1xf32>,
    } else {
    }
    return
  }
  func.func @transform_0(%arg0: i32, %arg1: i32) -> (i32, i32) {
    %c0_i32 = arith.constant 0 : i32
    %c0_i32_0 = arith.constant 0 : i32
    return %arg0, %c0_i32 : i32, i32
  }
  func.func @transform_1(%arg0: i32, %arg1: i32) -> (i32, i32) {
    %c0_i32 = arith.constant 0 : i32
    %c0_i32_0 = arith.constant 0 : i32
    return %c0_i32, %arg1 : i32, i32
  }
  func.func @transform_2(%arg0: i32, %arg1: i32) -> (i32, i32) {
    %c0_i32 = arith.constant 0 : i32
    %c0_i32_0 = arith.constant 0 : i32
    return %c0_i32, %arg1 : i32, i32
  }
  func.func @transform_3(%arg0: i32, %arg1: i32) -> (i32, i32) {
    %c0_i32 = arith.constant 0 : i32
    %c0_i32_0 = arith.constant 0 : i32
    return %arg0, %c0_i32 : i32, i32
  }
}

</mosaic_0001>

<bundles_post_ra>
// kernel: tpu_custom_call.1
= control target key start
LH: loop header
LB: loop body
LE: loop exit
PB: predicated region body
PF: predicated region fallthrough
CT: control target
= control target key end

     0   :  { %s1083_s0 = inlined_call_operand.hbm [shape: bf16[32,32], index: 0, kind: input, shape index: {}]   ;;  %s1084_s1 = inlined_call_operand.hbm [shape: bf16[32,384], index: 1, kind: input, shape index: {}]   ;;  %s1085_s2 = inlined_call_operand.vmem [shape: f32[1,384], index: 2, kind: input, shape index: {}]   ;;  %s1086_s3 = inlined_call_operand.vmem [shape: f32[32,1], index: 3, kind: output, shape index: {}]  }
   0x1   :  { %1090 = sst [smem:[#allocation11_spill]] %s1083_s0 }
   0x2   :  { %8 = vsyncpa [#allocation5], 0 }
   0x3   :  { %10 = vsyncpa [#allocation5 + $0x1], 0 }
   0x4   :  { %11 = vsyncpa [#allocation7], 0 }
   0x5   :  { %13 = vsyncpa [#allocation7 + $0x1], 0  ;;  %s857_s12 = smov 0   ;;  %s859_s13 = smov 0  }
   0x6   :  { %s861_s14 = smov 0   ;;  %s863_s15 = smov 0  }
   0x7   :  { %s865_s16 = smov 0   ;;  %s867_s17 = smov 0  }
   0x8   :  { %s869_s18 = smov 0   ;;  %s871_s19 = smov 0  }
   0x9   :  { %s873_s20 = smov 0   ;;  %s875_s21 = smov 0  }
   0xa   :  { %s877_s22 = smov 0  }
   0xb LB: > { %s515_s23 = sadd.s32 4294967295, %s825_s22   ;;  %s31_s24 = sadd.s32 1, %s821_s21  ;;  %s825_s22 = sphi %s877_s22, %s19_s22   ;;  %s821_s21 = sphi %s875_s21, %s1112_s21   ;;  %s817_s20 = sphi %s873_s20, %s1111_s20   ;;  %s813_s19 = sphi %s871_s19, %s1110_s19   ;;  %s809_s18 = sphi %s869_s18, %s1109_s18   ;;  %s805_s17 = sphi %s867_s17, %s1108_s17   ;;  %s801_s16 = sphi %s865_s16, %s1107_s16   ;;  %s797_s15 = sphi %s863_s15, %s1106_s15   ;;  %s793_s14 = sphi %s861_s14, %s1105_s14   ;;  %s789_s13 = sphi %s859_s13, %s1104_s13   ;;  %s785_s12 = sphi %s857_s12, %s1103_s12  }
   0xc   : > { %s38_s25 = sadd.s32 1, %s805_s17  ;;  %p45_p0 = scmp.ne.s32.totalorder %s805_s17, %s801_s16 }
   0xd   : > { %p46_p1 = scmp.eq.s32.totalorder %s825_s22, 0  ;;  %p51_p2 = scmp.ne.s32.totalorder %s801_s16, %s797_s15 }
   0xe   : > { %p917_p3 = scmp.eq.s32.totalorder %s515_s23, 0  ;;  %p561_p5 = scmp.lt.s32.totalorder %s825_s22, 6 }
   0xf   : > { %p47_p4 = por %p46_p1, %p45_p0  ;;  %s153_s28 = sand.u32 1, %s805_s17  }
  0x10   : > { %p926_p6 = por %p917_p3, %p51_p2  ;;  %s519_s29 = sshll.u32 %s153_s28, 3 }
  0x11   : > { %s538_s30 = sshll.u32 %s821_s21, 7  ;;  %s1093_s0 = sld [smem:[#allocation11_spill]] }
  0x12   : > { %s157_s7 = scalar_lea.vmem [#allocation4], %s519_s29  ;;  %p937_p7 = pnand %p561_p5, %p47_p4 }
  0x13   : > { %s164_s8 = sshll.u32 %s157_s7, 4  ;;  %p524_p8 = scmp.ge.s32.totalorder %s825_s22, 1  ;;  %s165_s8 = int_to_ptr.vmem [resolvable:$true] %s164_s8 }
  0x14   : > { %s154_s10 = scalar_lea.sflag [#allocation5], %s153_s28  ;;  %p677_p9 = pneg %p937_p7 }
  0x15   : > { %s688_s11 = scalar_lea.vmem %s165_s8, 128  ;;  %s827_s15 = smov [#allocation4]  }
  0x16   : > { %p689_p10 = scmp.ne.s32.totalorder %s165_s8, %s688_s11  ;;  %s693_s23 = sshll.u32 %s827_s15, 4  ;;  %s694_s23 = int_to_ptr.vmem [resolvable:$false] %s693_s23 }
  0x17   : > { %s163_s6 = scalar_lea.hbm %s1093_s0, %s538_s30  ;;  %s695_s29 = scalar_lea.vmem %s694_s23, 256 }
  0x18   : > { %p691_p11 = pnand %p689_p10, %p677_p9  ;;  %p696_p13 = scmp.lt.s32.totalorder %s165_s8, %s694_s23 }
  0x19   : > { %p697_p0 = scmp.lt.s32.totalorder %s695_s29, %s688_s11 }
  0x1a   : > { %p692_p12 = pneg %p691_p11 }
  0x1b   : > { %p698_p2 = por %p697_p0, %p696_p13 }
  0x1d   : > { %p699_p4 = pnand %p698_p2, %p692_p12 }
  0x1f   : > { %702 = shalt.err (!%p699_p4)
}
  0x20   : > { %s1087_s30 = smov 64   ;;  %s1088_s28 = smov 4  }
  0x21   : > { %557 = dma.hbm_to_vmem [thread:$0]  (!%p937_p7), %s163_s6, 128, %s165_s8, %s154_s10, %s1087_s30, %s1087_s30, %s1088_s28  }
  0x22   : > { %p198_p9 = scmp.lt.s32.totalorder %s825_s22, 7  ;;  %s28_s5 = sadd.s32 1, %s817_s20 }
  0x23   : > { %s64_s7 = sadd.s32 1, %s793_s14  ;;  %p29_p11 = scmp.ge.s32.totalorder %s28_s5, 3 }
  0x24   : > { %p952_p10 = pnand %p524_p8, %p198_p9  ;;  %p71_p12 = scmp.ne.s32.totalorder %s793_s14, %s789_s13 }
  0x25   : > { %p77_p13 = scmp.ne.s32.totalorder %s789_s13, %s785_s12  ;;  %s174_s9 = sand.u32 1, %s793_s14  }
  0x26   : > { %s1114_s5 = smov (%p29_p11, %s28_s5), 0  ;;  %s1116_s24 = smov (!%p29_p11, %s31_s24), %s821_s21 }
  0x27   : > { %1096 = sst [smem:[#allocation10_spill]] %s1114_s5  ;;  %s61_s6 = ssub.s32 %s817_s20, %s1114_s5 }
  0x28   : > { %p972_p7 = por %p71_p12, %p46_p1  ;;  %p33_p8 = scmp.ge.s32.totalorder %s1116_s24, 2 }
  0x29   : > { %p62_p0 = scmp.eq.s32.totalorder %s61_s6, 0  ;;  %p978_p2 = por %p77_p13, %p917_p3 }
  0x2a   : > { %s1118_s24 = smov (%p33_p8, %s1116_s24), 0  ;;  %s522_s15 = sshll.u32 %s174_s9, 4 }
  0x2b   : > { %s985_s10 = scalar_select %p62_p0, %s793_s14, %s64_s7  }
  0x2c   : > { %s35_s11 = ssub.s32 %s821_s21, %s1118_s24  ;;  %s523_s23 = sshll.u32 %s817_s20, 6 }
  0x2d   : > { %p36_p4 = scmp.eq.s32.totalorder %s35_s11, 0  ;;  %s178_s29 = scalar_lea.vmem [#allocation6], %s522_s15 }
  0x2e   : > { %s184_s30 = sshll.u32 %s178_s29, 4  ;;  %s183_s0 = scalar_lea.hbm %s1084_s1, %s523_s23  ;;  %s185_s30 = int_to_ptr.vmem [resolvable:$true] %s184_s30 }
  0x2f   : > { %s993_s28 = scalar_select %p36_p4, %s805_s17, %s38_s25  }
  0x30   : > { %p1002_p1 = pnand %p561_p5, %p972_p7  ;;  %s175_s7 = scalar_lea.sflag [#allocation7], %s174_s9 }
  0x31   : > { %s716_s11 = scalar_lea.vmem %s185_s30, 256  ;;  %s830_s25 = smov [#allocation6]  }
  0x32   : > { %p705_p3 = pneg %p1002_p1  ;;  %p717_p9 = scmp.ne.s32.totalorder %s185_s30, %s716_s11 }
  0x33   : > { %s721_s15 = sshll.u32 %s830_s25, 4  ;;  %s722_s15 = int_to_ptr.vmem [resolvable:$false] %s721_s15 }
  0x34   : > { %p719_p11 = pnand %p717_p9, %p705_p3  ;;  %s723_s29 = scalar_lea.vmem %s722_s15, 512 }
  0x35   : > { %p724_p13 = scmp.lt.s32.totalorder %s185_s30, %s722_s15  ;;  %p725_p8 = scmp.lt.s32.totalorder %s723_s29, %s716_s11 }
  0x36   : > { %p720_p12 = pneg %p719_p11 }
  0x37   : > { %p726_p0 = por %p725_p8, %p724_p13 }
  0x39   : > { %p727_p4 = pnand %p726_p0, %p720_p12 }
  0x3b   : > { %730 = shalt.err (!%p727_p4)
}
  0x3c   : > { %s831_s8 = smov 192   ;;  %s1100_s23 = smov 4  }
  0x3d   : > { %s1101_s9 = smov 64   ;;  %202 = sbr.rel (%p952_p10) target bundleno = 739 (0x2e3), region = 32 }
  0x3e   : > { %560 = dma.hbm_to_vmem [thread:$0]  (!%p1002_p1), %s183_s0, 256, %s185_s30, %s175_s7, %s831_s8, %s1101_s9, %s1100_s23  }
  0x3f   : > { %s204_s6 = sand.u32 (!%p952_p10), 1, %s801_s16  }
  0x40   : > { %s1015_s26 = sshll.u32 (!%p952_p10), %s204_s6, 3  ;;  %s205_s25 = scalar_lea.sflag (!%p952_p10), [#allocation5], %s204_s6 }
  0x41   : > { %s208_s11 = scalar_lea.vmem (!%p952_p10), [#allocation4], %s1015_s26 }
  0x42   : > { %776 = dma.done.wait (%p926_p6), %s205_s25, 128  }
  0x43   : > { %778 = vsyncadd (%p926_p6), %s205_s25, 4294967168  ;;  %s213_s5 = sand.u32 1, %s789_s13  }
  0x44   : > { %s526_s0 = sshll.u32 %s213_s5, 4  ;;  %s214_s30 = scalar_lea.sflag [#allocation7], %s213_s5 }
  0x45   : > { %s217_s4 = scalar_lea.vmem [#allocation6], %s526_s0 }
  0x46   : > { %780 = dma.done.wait (%p978_p2), %s214_s30, 256  }
  0x47   : > { %782 = vsyncadd (%p978_p2), %s214_s30, 4294967040  ;;  %p249_p5 = scmp.lt.s32.totalorder %s809_s18, 2  ;;  %s527_s7 = sshll.u32 %s813_s19, 1 }
  0x48   : > { %p253_p10 = scmp.lt.s32.totalorder %s527_s7, 3  ;;  %p529_p6 = scmp.ne.s32.totalorder %s809_s18, 0 }
  0x49   : > { %s250_s15 = scalar_select %p249_p5, %s809_s18, 2 }
  0x4a   : > { %s1120_s7 = smov (!%p253_p10, %s527_s7), 3  ;;  %262 = sbr.rel (%p529_p6) target bundleno = 82 (0x52), region = 44 }
  0x4b   : > { %s251_s8 = scalar_lea.vmem %s1085_s2, %s250_s15  ;;  %s528_s23 = sshll.u32 %s1120_s7, 3 }
  0x4c   : > { %s1036_s25 = scalar_lea.vmem %s1086_s3, %s528_s23 }
  0x4f   : > { %vm263_vm0 = vcmask 7168   ;;  %v832_v0 = vmov -inf   ;;  %v833_v1 = vmov 0.0  }
  0x50   : > { %264 = vst.msk [vmem:[#allocation2] sm:$0xff] %vm263_vm0, %v832_v0  ;;  %265 = vst.msk [vmem:[#allocation2 + $0x8] sm:$0xff] %vm263_vm0, %v832_v0 }
  0x51   : > { %266 = vst.msk [vmem:[#allocation3] sm:$0xff] %vm263_vm0, %v833_v1  ;;  %267 = vst.msk [vmem:[#allocation3 + $0x8] sm:$0xff] %vm263_vm0, %v833_v1 }
  0x52 PF: > { %v660_v2 = vld [vmem:[%s217_s4 + $0x8] sm:$0xff]   ;;  %v834_v3 = vmov 0.0   ;;  %v661_v4 = vld [vmem:[%s217_s4] sm:$0xff]   ;;  %vm835_vm1 = vmmov 0   ;;  %vm298_vm2 = vcmask 261120   ;;  %v836_v13 = vmov 0  }
  0x53   : > { %542 = vmatprep.subr.bf16.mxu0 %v834_v3  ;;  %546 = vmatprep.mubr.msk.bf16.mxu0 %vm835_vm1, %v834_v3  ;;  %v662_v5 = vld [vmem:[%s208_s11] sm:$0xff]   ;;  %vm383_vm3 = vcmask 7168   ;;  %p535_p7 = scmp.ne.s32.totalorder %s809_s18, 2 }
  0x54   : > { %543 = vmatpush3.bf16.msra.mxu0 %v660_v2  ;;  %v530_v6 = vld [vmem:[%s251_s8] ss:$0 sm:$0xff]  ;;  %658 = vset.pattern.permute.xlu1 %v836_v13 }
  0x55   : > { %544 = vmatprep.subr.bf16.mxu0 %v834_v3  ;;  %659 = vset.pattern.permute.xlu0 %v836_v13 }
  0x57   : > { %v343_v14 = vld [vmem:[#allocation2] sm:$0xff]  ;;  %v344_v17 = vld [vmem:[#allocation2 + $0x8] sm:$0xff] }
  0x58   : > { %545 = vmatpush3.bf16.msra.mxu0 %v661_v4  ;;  %v351_v33 = vld [vmem:[#allocation3] sm:$0xff]  ;;  %v352_v37 = vld [vmem:[#allocation3 + $0x8] sm:$0xff] }
  0x5b   : > { %547 = vmatmul.mubr.msk.bf16.vlgmr.msra.gmra.mxu0 %vm298_vm2, %v662_v5 }
 0x11b   : > { %v336_v7 = vpop.f32.mrf.mxu0 }
 0x11c   : > { %v337_v8 = vadd.f32 %v530_v6, %v336_v7 }
 0x11d   : > { %v548_v9 = vpop.f32.mrf.mxu0 }
 0x11e   : > { %345 = vmax.xlane.f32.xlu0 %v337_v8 }
 0x11f   : > { %v339_v10 = vpop.f32.mrf.mxu0 }
 0x120   : > { %v340_v11 = vadd.f32 %v530_v6, %v339_v10 }
 0x121   : > { %v549_v12 = vpop.f32.mrf.mxu0 }
 0x122   : > { %347 = vmax.xlane.f32.xlu0 %v340_v11 }
 0x1a7   : > { %v346_v15 = vpop.xlane.xlu0 %345 }
 0x1a8   : > { %v349_v16 = vmax.f32 %v343_v14, %v346_v15 }
 0x1aa   : > { %v353_v18 = vsub.f32 %v343_v14, %v349_v16  ;;  %386 = vst.msk [vmem:[#allocation2] sm:$0xff] %vm383_vm3, %v349_v16  ;;  %363 = vperm.xlu1 %658, %v349_v16  }
 0x1ab   : > { %v348_v19 = vpop.xlane.xlu0 %347 }
 0x1ac   : > { %v350_v20 = vmax.f32 %v344_v17, %v348_v19  ;;  %v355_v30 = vmul.f32 1.442695, %v353_v18 }
 0x1ae   : > { %v354_v21 = vsub.f32 %v344_v17, %v350_v20  ;;  %387 = vst.msk [vmem:[#allocation2 + $0x8] sm:$0xff] %vm383_vm3, %v350_v20  ;;  %368 = vperm.xlu1 %658, %v350_v20  }
 0x1b0   : > { %v357_v31 = vmul.f32 1.442695, %v354_v21 }
 0x225   : > { %v364_v22 = vpop.permute.xlu1 %363 }
 0x226   : > { %v371_v23 = vsub.f32 %v337_v8, %v364_v22 }
 0x228   : > { %v373_v24 = vmul.f32 1.442695, %v371_v23 }
 0x229   : > { %v369_v25 = vpop.permute.xlu1 %368 }
 0x22a   : > { %663 = vpow2.f32 %v373_v24  ;;  %v372_v26 = vsub.f32 %v340_v11, %v369_v25 }
 0x22c   : > { %v375_v27 = vmul.f32 1.442695, %v372_v26 }
 0x22e   : > { %665 = vpow2.f32 %v375_v27 }
 0x22f   : > { %667 = vpow2.f32 %v355_v30 }
 0x230   : > { %669 = vpow2.f32 %v357_v31 }
 0x237   : > { %v664_v28 = vpop.eup %663 }
 0x238   : > { %377 = vadd.xlane.f32.xlu0 %v664_v28 }
 0x23b   : > { %v666_v29 = vpop.eup %665 }
 0x23c   : > { %379 = vadd.xlane.f32.xlu1 %v666_v29  ;;  %v668_v32 = vpop.eup %667 }
 0x23d   : > { %v359_v34 = vmul.f32 %v668_v32, %v351_v33  ;;  %v670_v35 = vpop.eup %669 }
 0x23e   : > { %v360_v39 = vmul.f32 %v670_v35, %v352_v37 }
 0x2c1   : > { %v378_v36 = vpop.xlane.xlu0 %377 }
 0x2c2   : > { %v381_v38 = vadd.f32 %v378_v36, %v359_v34 }
 0x2c4   : > { %384 = vst.msk [vmem:[#allocation3] sm:$0xff] %vm383_vm3, %v381_v38  ;;  %391 = sbr.rel (%p535_p7) target bundleno = 739 (0x2e3), region = 48 }
 0x2c5   : > { %v380_v40 = vpop.xlane.xlu1 %379 }
 0x2c6   : > { %v382_v41 = vadd.f32 %v380_v40, %v360_v39 }
 0x2c8   : > { %385 = vst.msk [vmem:[#allocation3 + $0x8] sm:$0xff] %vm383_vm3, %v382_v41 }
 0x2c9   : > { %v392_v45 = vld [vmem:[#allocation2] sm:$0xff]  ;;  %v393_v48 = vld [vmem:[#allocation2 + $0x8] sm:$0xff] }
 0x2cb   : > { %v394_v42 = vld [vmem:[#allocation3] sm:$0xff] }
 0x2cc   : > { %671 = vlog2.f32 %v394_v42 }
 0x2cf   : > { %v395_v43 = vld [vmem:[#allocation3 + $0x8] sm:$0xff] }
 0x2d0   : > { %673 = vlog2.f32 %v395_v43 }
 0x2d9   : > { %v672_v44 = vpop.eup %671 }
 0x2da   : > { %v397_v47 = vmul.f32 0.6931472, %v672_v44 }
 0x2dc   : > { %v400_v50 = vadd.f32 %v397_v47, %v392_v45 }
 0x2dd   : > { %v674_v46 = vpop.eup %673 }
 0x2de   : > { %v399_v49 = vmul.f32 0.6931472, %v674_v46  ;;  %402 = vst.msk [vmem:[%s1036_s25] sm:$0xff] %vm383_vm3, %v400_v50 }
 0x2e0   : > { %v401_v51 = vadd.f32 %v399_v49, %v393_v48 }
 0x2e2   : > { %403 = vst.msk [vmem:[%s1036_s25 + $0x8] sm:$0xff] %vm383_vm3, %v401_v51 }
 0x2e3 PF: > { %s19_s22 = sadd.s32 1, %s825_s22   ;;  %s1102_s26 = sld [smem:[#allocation10_spill]] }
 0x2e4   : > { %p16_p2 = scmp.ge.s32.totalorder %s19_s22, 8   ;;  %s1103_s12 = smov %s789_s13 }
 0x2e5   : > { %s1104_s13 = smov %s793_s14  ;;  %s1105_s14 = smov %s985_s10 }
 0x2e6   : > { %s1106_s15 = smov %s801_s16  ;;  %s1107_s16 = smov %s805_s17 }
 0x2e7   : > { %s1108_s17 = smov %s993_s28  ;;  %s1109_s18 = smov %s817_s20 }
 0x2e8   : > { %s1110_s19 = smov %s821_s21  ;;  %s1112_s21 = smov %s1118_s24 }
 0x2e9   : > { %s1111_s20 = smov %s1102_s26  ;;  %18 = sbr.rel (!%p16_p2) target bundleno = 11 (0xb), region = 96 }
 0x2ee   :  { %426 = vsyncpa [#allocation5], 1 }
 0x2ef   :  { %428 = vsyncpa [#allocation5 + $0x1], 1 }
 0x2f0   :  { %429 = vsyncpa [#allocation7], 1 }
 0x2f1   :  { %431 = vsyncpa [#allocation7 + $0x1], 1 }

</bundles_post_ra>
